<compile_context>
chip_gen: v5e
topology: v5e:2x2
jax: 0.10.0
libtpu: 0.0.40
codegen_flags: <defaults>
</compile_context>

<pallas_src>
import jax
import jax.numpy as jnp
from jax import lax
from jax.experimental import pallas as pl
from jax.experimental.pallas import tpu as pltpu


_VOCAB_CHUNK = 256  # contraction-chunk width; matches v6e/v7x MXU K = 256


def _round_up(x, m):
    return ((x + m - 1) // m) * m


def _gather_kernel(idx_ref, pos_ref, neg_ref, x_ref, y_ref):
    # idx_ref: (Tn, 1) int32 token ids (sublane-major -> no relayout needed)
    # pos_ref: (V, Dp) f32     neg_ref: (V, Dn) f32   (VMEM-resident tables)
    # x_ref:   (Tn, Dp)        y_ref:   (Tn, Dn)
    tn = idx_ref.shape[0]
    v, dp = pos_ref.shape
    dn = neg_ref.shape[1]

    idx = idx_ref[...]  # (Tn, 1)

    def chunk(base, size, acc_x, acc_y):
        # Build a (Tn, size) one-hot for this vocab chunk and contract it
        # immediately (stays small; never a full (Tn, V) VMEM round trip).
        rows = base + lax.broadcasted_iota(jnp.int32, (tn, size), 1)
        onehot = (idx == rows).astype(jnp.float32)
        acc_x = acc_x + jnp.dot(
            onehot, pos_ref[pl.ds(base, size), :],
            preferred_element_type=jnp.float32,
            precision=lax.Precision.HIGHEST)
        acc_y = acc_y + jnp.dot(
            onehot, neg_ref[pl.ds(base, size), :],
            preferred_element_type=jnp.float32,
            precision=lax.Precision.HIGHEST)
        return acc_x, acc_y

    acc_x = jnp.zeros((tn, dp), jnp.float32)
    acc_y = jnp.zeros((tn, dn), jnp.float32)

    vc = min(v, _VOCAB_CHUNK)          # static
    n_full = v // vc                   # static
    rem = v - n_full * vc              # static

    if n_full == 1:
        acc_x, acc_y = chunk(0, vc, acc_x, acc_y)
    elif n_full > 1:
        def body(c, carry):
            return chunk(c * vc, vc, *carry)
        acc_x, acc_y = lax.fori_loop(0, n_full, body, (acc_x, acc_y),
                                     unroll=True)
    if rem > 0:
        acc_x, acc_y = chunk(n_full * vc, rem, acc_x, acc_y)

    x_ref[...] = acc_x.astype(x_ref.dtype)
    y_ref[...] = acc_y.astype(y_ref.dtype)


def pseudo_euclidean_embedding_forward(indices, pos_table, neg_table,
                                       *, block_tokens=256):
    """indices: int array (any shape); pos_table: (V, Dp); neg_table: (V, Dn).

    Returns (x, y) with shapes indices.shape + (Dp,) and indices.shape + (Dn,),
    matching PseudoEuclideanEmbedding1.forward.
    """
    idx_shape = tuple(indices.shape)
    V, Dp = pos_table.shape
    V2, Dn = neg_table.shape
    assert V == V2, "tables must share the vocabulary dimension"

    N = 1
    for s in idx_shape:
        N *= int(s)

    # Flatten + clamp indices (guards against silent OOB gathers).
    flat_idx = jnp.clip(indices.reshape(N).astype(jnp.int32), 0, V - 1)

    # Token block: big enough to fill the MXU M dim and amortize the ~0.35us
    # per-step overhead, but capped at ceil(N/2) so the parallel grid has at
    # least 2 steps (v7x has 2 TensorCores; harmless on 1-TC chips).
    half = -(-N // 2)
    Tn = max(8, min(block_tokens, _round_up(half, 8)))
    Npad = _round_up(N, Tn)
    G = Npad // Tn

    # (Npad, 1) keeps token ids on the sublane axis.
    idx_padded = jnp.zeros((Npad, 1), jnp.int32).at[:N, 0].set(flat_idx)

    # --- VMEM budget: computed from actual usage, not hard-coded. ---
    bpe = jnp.dtype(pos_table.dtype).itemsize
    vc = min(V, _VOCAB_CHUNK)
    needed = (
        2 * V * (Dp + Dn) * bpe          # tables (worst case double-buffered)
        + 2 * Tn * 1 * 4                 # index blocks (double-buffered)
        + 2 * Tn * (Dp + Dn) * bpe       # output blocks (double-buffered)
        + Tn * (Dp + Dn) * 4             # f32 accumulators
        + Tn * vc * 4                    # one materialized one-hot chunk
    )
    try:
        vmem_cap = int(pltpu.get_tpu_info().vmem_capacity_bytes)
    except Exception:
        vmem_cap = 64 * 1024 * 1024      # v7x per-TC physical (most restrictive)
    vmem_limit = int(max(32 << 20, min(needed + (8 << 20), int(0.8 * vmem_cap))))

    out_x, out_y = pl.pallas_call(
        _gather_kernel,
        out_shape=(
            jax.ShapeDtypeStruct((Npad, Dp), pos_table.dtype),
            jax.ShapeDtypeStruct((Npad, Dn), neg_table.dtype),
        ),
        grid_spec=pltpu.PrefetchScalarGridSpec(
            num_scalar_prefetch=0,
            grid=(G,),
            in_specs=[
                # (Tn, 1) block of token ids per grid step.
                pl.BlockSpec((Tn, 1), lambda i: (i, 0)),
                # Whole tables resident in VMEM (constant block index ->
                # fetched once, never re-DMAed).
                pl.BlockSpec((V, Dp), lambda i: (0, 0)),
                pl.BlockSpec((V, Dn), lambda i: (0, 0)),
            ],
            out_specs=[
                pl.BlockSpec((Tn, Dp), lambda i: (i, 0)),
                pl.BlockSpec((Tn, Dn), lambda i: (i, 0)),
            ],
        ),
        compiler_params=pltpu.CompilerParams(
            # Token blocks are independent -> shard across TensorCores.
            dimension_semantics=("parallel",),
            vmem_limit_bytes=vmem_limit,
        ),
    )(idx_padded, pos_table, neg_table)

    x = out_x[:N].reshape(*idx_shape, Dp)
    y = out_y[:N].reshape(*idx_shape, Dn)
    return x, y


def init_params(key, num_embeddings, positive_dim, negative_dim, padding_idx=None):
    """Deterministic init mimicking nn.Embedding (N(0,1), padding row zeroed)."""
    k1, k2 = jax.random.split(key)
    pos = jax.random.normal(k1, (num_embeddings, positive_dim), dtype=jnp.float32)
    neg = jax.random.normal(k2, (num_embeddings, negative_dim), dtype=jnp.float32)
    if padding_idx is not None:
        pos = pos.at[padding_idx].set(0.0)
        neg = neg.at[padding_idx].set(0.0)
    return pos, neg


if __name__ == "__main__":
    def run_case(key, num_embeddings, positive_dim, negative_dim, padding_idx, B, S):
        k_params, k_idx = jax.random.split(key)
        pos_table, neg_table = init_params(
            k_params, num_embeddings, positive_dim, negative_dim, padding_idx
        )
        indices = jax.random.randint(k_idx, (B, S), 0, num_embeddings,
                                     dtype=jnp.int32)
        indices = indices.at[0, 0].set(padding_idx)  # ensure a padding row shows up

        fwd = jax.jit(pseudo_euclidean_embedding_forward)
        x, y = fwd(indices, pos_table, neg_table)
        x = jax.block_until_ready(x)
        y = jax.block_until_ready(y)

        x_ref = jnp.take(pos_table, indices, axis=0)
        y_ref = jnp.take(neg_table, indices, axis=0)
        assert x.shape == (B, S, positive_dim) and y.shape == (B, S, negative_dim)
        assert jnp.allclose(x, x_ref, rtol=1e-6, atol=1e-6)
        assert jnp.allclose(y, y_ref, rtol=1e-6, atol=1e-6)

    key = jax.random.PRNGKey(0)
    k1, k2 = jax.random.split(key)
    # Small shapes implied by the module (B=2, S=8, V=64, Dp=32, Dn=16).
    run_case(k1, 64, 32, 16, 0, 2, 8)
    # Larger vocab exercises the chunked (fori_loop + remainder) contraction path.
    run_case(k2, 600, 32, 16, 0, 3, 5)

    print("KERNEL_OK")
</pallas_src>

<mosaic_0001>
module attributes {stable_mosaic.version = 11 : i64} {
  func.func @_gather_kernel(%arg0: i32, %arg1: memref<8x1xi32, #tpu.memory_space<vmem>>, %arg2: memref<64x32xf32, #tpu.memory_space<vmem>>, %arg3: memref<64x16xf32, #tpu.memory_space<vmem>>, %arg4: memref<8x32xf32, #tpu.memory_space<vmem>>, %arg5: memref<8x16xf32, #tpu.memory_space<vmem>>) attributes {dimension_semantics = [#tpu.dimension_semantics<parallel>], iteration_bounds = array<i64: 2>, scalar_prefetch = 0 : i64, scratch_operands = 0 : i64, tpu.core_type = #tpu.core_type<tc>, window_params = [{transform_indices = @transform_0, window_bounds = array<i64: 8, 1>}, {pipeline_mode = #tpu.pipeline_mode<synchronous>, transform_indices = @transform_1, window_bounds = array<i64: 64, 32>}, {pipeline_mode = #tpu.pipeline_mode<synchronous>, transform_indices = @transform_2, window_bounds = array<i64: 64, 16>}, {transform_indices = @transform_3, window_bounds = array<i64: 8, 32>}, {transform_indices = @transform_4, window_bounds = array<i64: 8, 16>}]} {
    %c0 = arith.constant 0 : index
    %c0_0 = arith.constant 0 : index
    %0 = vector.load %arg1[%c0, %c0_0] : memref<8x1xi32, #tpu.memory_space<vmem>>, vector<8x1xi32>
    %cst = arith.constant 0.000000e+00 : f32
    %1 = vector.broadcast %cst : f32 to vector<8x32xf32>
    %cst_1 = arith.constant 0.000000e+00 : f32
    %2 = vector.broadcast %cst_1 : f32 to vector<8x16xf32>
    %3 = tpu.iota {dimensions = array<i32: 1>} : vector<8x64xi32>
    %c0_i32 = arith.constant 0 : i32
    %4 = vector.broadcast %c0_i32 : i32 to vector<8x64xi32>
    %5 = arith.addi %4, %3 : vector<8x64xi32>
    %6 = vector.broadcast %0 : vector<8x1xi32> to vector<8x64xi32>
    %7 = arith.cmpi eq, %6, %5 : vector<8x64xi32>
    %8 = arith.extui %7 : vector<8x64xi1> to vector<8x64xi32>
    %9 = arith.sitofp %8 : vector<8x64xi32> to vector<8x64xf32>
    %c0_2 = arith.constant 0 : index
    %c0_3 = arith.constant 0 : index
    %10 = vector.load %arg2[%c0_2, %c0_3] : memref<64x32xf32, #tpu.memory_space<vmem>>, vector<64x32xf32>
    %cst_4 = arith.constant dense<0.000000e+00> : vector<8x32xf32>
    %11 = tpu.matmul %9, %10, %cst_4 {dimension_numbers = #tpu.dot_dimension_numbers<[1], [0], [0], [1], [0, 0, 1, 1], [], []>, precision = #tpu.contract_precision<fp32>} : vector<8x64xf32>, vector<64x32xf32>, vector<8x32xf32> -> vector<8x32xf32>
    %12 = arith.addf %1, %11 : vector<8x32xf32>
    %c0_5 = arith.constant 0 : index
    %c0_6 = arith.constant 0 : index
    %13 = vector.load %arg3[%c0_5, %c0_6] : memref<64x16xf32, #tpu.memory_space<vmem>>, vector<64x16xf32>
    %cst_7 = arith.constant dense<0.000000e+00> : vector<8x16xf32>
    %14 = tpu.matmul %9, %13, %cst_7 {dimension_numbers = #tpu.dot_dimension_numbers<[1], [0], [0], [1], [0, 0, 1, 1], [], []>, precision = #tpu.contract_precision<fp32>} : vector<8x64xf32>, vector<64x16xf32>, vector<8x16xf32> -> vector<8x16xf32>
    %15 = arith.addf %2, %14 : vector<8x16xf32>
    %c0_8 = arith.constant 0 : index
    %c0_9 = arith.constant 0 : index
    %16 = vector.load %arg4[%c0_8, %c0_9] : memref<8x32xf32, #tpu.memory_space<vmem>>, vector<8x32xf32>
    tpu.vector_store %arg4[%c0_8, %c0_9], %12 {strides = array<i32>} : memref<8x32xf32, #tpu.memory_space<vmem>>, vector<8x32xf32>,
    %c0_10 = arith.constant 0 : index
    %c0_11 = arith.constant 0 : index
    %17 = vector.load %arg5[%c0_10, %c0_11] : memref<8x16xf32, #tpu.memory_space<vmem>>, vector<8x16xf32>
    tpu.vector_store %arg5[%c0_10, %c0_11], %15 {strides = array<i32>} : memref<8x16xf32, #tpu.memory_space<vmem>>, vector<8x16xf32>,
    return
  }
  func.func @transform_0(%arg0: i32) -> (i32, i32) {
    %c0_i32 = arith.constant 0 : i32
    %c0_i32_0 = arith.constant 0 : i32
    return %arg0, %c0_i32 : i32, i32
  }
  func.func @transform_1(%arg0: i32) -> (i32, i32) {
    %c0_i32 = arith.constant 0 : i32
    %c0_i32_0 = arith.constant 0 : i32
    %c0_i32_1 = arith.constant 0 : i32
    return %c0_i32, %c0_i32_0 : i32, i32
  }
  func.func @transform_2(%arg0: i32) -> (i32, i32) {
    %c0_i32 = arith.constant 0 : i32
    %c0_i32_0 = arith.constant 0 : i32
    %c0_i32_1 = arith.constant 0 : i32
    return %c0_i32, %c0_i32_0 : i32, i32
  }
  func.func @transform_3(%arg0: i32) -> (i32, i32) {
    %c0_i32 = arith.constant 0 : i32
    %c0_i32_0 = arith.constant 0 : i32
    return %arg0, %c0_i32 : i32, i32
  }
  func.func @transform_4(%arg0: i32) -> (i32, i32) {
    %c0_i32 = arith.constant 0 : i32
    %c0_i32_0 = arith.constant 0 : i32
    return %arg0, %c0_i32 : i32, i32
  }
}

</mosaic_0001>

<bundles_post_ra>
// kernel: pseudo_euclidean_embedding_forward.1
= control target key start
LH: loop header
LB: loop body
LE: loop exit
PB: predicated region body
PF: predicated region fallthrough
CT: control target
= control target key end

     0   :  { %10 = vsyncpa [#allocation3], 0  ;;  %s1418_s0 = inlined_call_operand.vmem [shape: s32[16,1], index: 0, kind: input, shape index: {}]   ;;  %s1419_s1 = inlined_call_operand.vmem [shape: f32[64,32], index: 1, kind: input, shape index: {}]   ;;  %s1420_s2 = inlined_call_operand.vmem [shape: f32[64,16], index: 2, kind: input, shape index: {}]   ;;  %s1421_s3 = inlined_call_operand.hbm [shape: f32[16,32], index: 3, kind: output, shape index: {0}]   ;;  %s1422_s4 = inlined_call_operand.hbm [shape: f32[16,16], index: 4, kind: output, shape index: {1}]  }
   0x1   :  { %12 = vsyncpa [#allocation3 + $0x1], 0 }
   0x2   :  { %13 = vsyncpa [#allocation5], 0 }
   0x3   :  { %15 = vsyncpa [#allocation5 + $0x1], 0  ;;  %s1028_s15 = smov 0   ;;  %s1030_s16 = smov 0  }
   0x4   :  { %s1032_s17 = smov 0   ;;  %s1034_s18 = smov 0  }
   0x5 LB: > { %s1049_s19 = sadd.s32 4294967295, %s999_s18   ;;  %s838_s20 = sadd.s32 4294967294, %s999_s18   ;;  %s999_s18 = sphi %s1034_s18, %s1428_s18   ;;  %s995_s17 = sphi %s1032_s17, %s1427_s17   ;;  %s991_s16 = sphi %s1030_s16, %s1426_s16   ;;  %s987_s15 = sphi %s1028_s15, %s1425_s15  }
   0x6   : > { %s1053_s21 = sadd.s32 1, %s999_s18   ;;  %s96_s22 = sadd.s32 1, %s995_s17 }
   0x7   : > { %s93_s23 = ssub.s32 %s999_s18, %s1053_s21  ;;  %p106_p0 = scmp.ne.s32.totalorder %s995_s17, %s991_s16 }
   0x8   : > { %p94_p1 = scmp.eq.s32.totalorder %s93_s23, 0  ;;  %p107_p2 = scmp.eq.s32.totalorder %s1049_s19, 1 }
   0x9   : > { %p112_p3 = scmp.ne.s32.totalorder %s991_s16, %s987_s15  ;;  %p113_p4 = scmp.eq.s32.totalorder %s838_s20, 1 }
   0xa   : > { %s1064_s24 = scalar_select %p94_p1, %s995_s17, %s96_s22  }
   0xb   : > { %p1066_p5 = por %p107_p2, %p106_p0  ;;  %p1070_p6 = por %p113_p4, %p112_p3 }
   0xc   : > { %p841_p7 = scmp.ge.s32.totalorder %s999_s18, 1  ;;  %p170_p8 = scmp.lt.s32.totalorder %s999_s18, 3 }
   0xe   : > { %p171_p9 = pnand %p841_p7, %p170_p8 }
   0xf   : > { %p200_p10 = scmp.lt.s32.totalorder (!%p171_p9), %s1049_s19, 1  ;;  %s854_s5 = sshll.u32 (!%p171_p9), %s1049_s19, 3 }
  0x10   : > { %174 = sbr.rel (%p171_p9) target bundleno = 310 (0x136), region = 32  ;;  %s727_s9 = scalar_lea.hbm (!%p171_p9), %s1421_s3, %s854_s5 }
  0x11   : > { %s731_s12 = sshll.u32 (!%p171_p9), %s727_s9, 4  ;;  %s732_s12 = int_to_ptr.hbm [resolvable:$true] %s731_s12 }
  0x12   : > { %s919_s14 = sshra.s32 (!%p171_p9), %s732_s12, 4  ;;  %s920_s14 = int_to_ptr.hbm [resolvable:$true] %s919_s14 }
  0x13   : > { %s921_s20 = scalar_lea.hbm (!%p171_p9), %s920_s14, 8  ;;  %p926_p0 = scmp.lt.s32.totalorder (!%p171_p9), %s920_s14, %s1421_s3 }
  0x14   : > { %p922_p11 = scmp.ne.s32.totalorder (!%p171_p9), %s920_s14, %s921_s20 }
  0x15   : > { %v220_v0 = vld [vmem:[%s1419_s1 + $0x38] sm:$0xff]  ;;  %v219_v1 = vld [vmem:[%s1419_s1 + $0x30] sm:$0xff]  ;;  %v218_v2 = vld [vmem:[%s1419_s1 + $0x28] sm:$0xff]  ;;  %v1001_v3 = vmov 0   ;;  %s201_s13 = scalar_select %p200_p10, %s1049_s19, 1  ;;  %vm221_vm0 = vcmask 523264  }
  0x16   : > { %904 = vset.pattern.permute.xlu0 %v1001_v3  ;;  %v1086_v4 = vand.u32 4294901760, %v220_v0  ;;  %v1088_v5 = vand.u32 4294901760, %v219_v1  ;;  %v1090_v6 = vand.u32 4294901760, %v218_v2  ;;  %v217_v7 = vld [vmem:[%s1419_s1 + $0x20] sm:$0xff]  ;;  %v216_v8 = vld [vmem:[%s1419_s1 + $0x18] sm:$0xff]  ;;  %v215_v9 = vld [vmem:[%s1419_s1 + $0x10] sm:$0xff]  ;;  %p923_p12 = pnand %p922_p11, %p1066_p5 }
  0x17   : > { %v1102_v10 = vand.u32 4294901760, %v217_v7  ;;  %v1104_v11 = vand.u32 4294901760, %v216_v8  ;;  %v1106_v12 = vand.u32 4294901760, %v215_v9  ;;  %v214_v13 = vld [vmem:[%s1419_s1 + $0x8] sm:$0xff]  ;;  %v213_v14 = vld [vmem:[%s1419_s1] sm:$0xff]  ;;  %s844_s27 = sshll.u32 %s201_s13, 3 }
  0x18   : > { %v1115_v15 = vsub.f32 %v220_v0, %v1086_v4  ;;  %v1118_v16 = vsub.f32 %v219_v1, %v1088_v5  ;;  %v1121_v17 = vsub.f32 %v218_v2, %v1090_v6  ;;  %366 = vmatpush.msra.mxu3 %v1086_v4  ;;  %234 = vmatpush.msra.mxu0 %v1086_v4  ;;  %v1125_v18 = vand.u32 4294901760, %v214_v13  ;;  %s203_s30 = scalar_lea.vmem %s1418_s0, %s844_s27  ;;  %v469_v35 = vld [vmem:[%s1420_s2 + $0x38] sm:$0xff]  ;;  %v468_v36 = vld [vmem:[%s1420_s2 + $0x30] sm:$0xff]  ;;  %v467_v37 = vld [vmem:[%s1420_s2 + $0x28] sm:$0xff]  ;;  %p924_p13 = pneg %p923_p12 }
  0x19   : > { %v1128_v19 = vsub.f32 %v217_v7, %v1102_v10  ;;  %v1131_v20 = vsub.f32 %v216_v8, %v1104_v11  ;;  %v1134_v21 = vsub.f32 %v215_v9, %v1106_v12  ;;  %v1136_v22 = vand.u32 4294901760, %v213_v14  ;;  %v204_v26 = vld [vmem:[%s203_s30] sm:$0xff]  ;;  %s1361_s30 = sand.u32 1, %s991_s16   ;;  %s925_s27 = scalar_lea.hbm %s1421_s3, 16 }
  0x1a   : > { %v268_v23 = vand.u32 4294901760, %v1115_v15  ;;  %v274_v24 = vand.u32 4294901760, %v1118_v16  ;;  %329 = vmatpush.msra.mxu2 %v1115_v15  ;;  %v280_v25 = vand.u32 4294901760, %v1121_v17  ;;  %368 = vmatpush.msra.mxu3 %v1088_v5  ;;  %v1150_v29 = vsub.f32 %v214_v13, %v1125_v18  ;;  %v466_v41 = vld [vmem:[%s1420_s2 + $0x20] sm:$0xff]  ;;  %s842_s6 = sshll.u32 %s1361_s30, 3  ;;  %s712_s13 = scalar_lea.sflag [#allocation3], %s1361_s30 }
  0x1b   : > { %v286_v27 = vand.u32 4294901760, %v1128_v19  ;;  %v292_v28 = vand.u32 4294901760, %v1131_v20  ;;  %236 = vmatpush.msra.mxu0 %v1088_v5  ;;  %208 = vperm.xlu0 %904, %v204_v26   ;;  %v298_v33 = vand.u32 4294901760, %v1134_v21  ;;  %v1166_v34 = vsub.f32 %v213_v14, %v1136_v22  ;;  %v465_v26 = vld [vmem:[%s1420_s2 + $0x18] sm:$0xff]  ;;  %s192_s10 = scalar_lea.vmem [#allocation2], %s842_s6  ;;  %p927_p1 = scmp.lt.s32.totalorder %s925_s27, %s921_s20 }
  0x1c   : > { %v269_v30 = vsub.f32 %v1115_v15, %v268_v23  ;;  %v275_v31 = vsub.f32 %v1118_v16, %v274_v24  ;;  %v281_v32 = vsub.f32 %v1121_v17, %v280_v25  ;;  %332 = vmatpush.msra.mxu2 %v1118_v16  ;;  %370 = vmatpush.msra.mxu3 %v1090_v6  ;;  %v304_v43 = vand.u32 4294901760, %v1150_v29  ;;  %s729_s11 = sshll.u32 %s192_s10, 4  ;;  %s730_s11 = int_to_ptr.vmem [resolvable:$true] %s729_s11 }
  0x1d   : > { %238 = vmatpush.msra.mxu0 %v1090_v6  ;;  %v287_v40 = vsub.f32 %v1128_v19, %v286_v27  ;;  %v293_v42 = vsub.f32 %v1131_v20, %v292_v28  ;;  %v1191_v45 = vand.u32 4294901760, %v469_v35  ;;  %v1193_v46 = vand.u32 4294901760, %v468_v36  ;;  %p928_p2 = por %p927_p1, %p926_p0 }
  0x1e   : > { %v270_v38 = vand.u32 4294901760, %v269_v30  ;;  %v276_v39 = vand.u32 4294901760, %v275_v31  ;;  %335 = vmatpush.msra.mxu2 %v1121_v17  ;;  %372 = vmatpush.msra.mxu3 %v1102_v10  ;;  %v282_v44 = vand.u32 4294901760, %v281_v32  ;;  %v1195_v47 = vand.u32 4294901760, %v467_v37  ;;  %v462_v17 = vld [vmem:[%s1420_s2] sm:$0xff] }
  0x1f   : > { %240 = vmatpush.msra.mxu0 %v1102_v10  ;;  %v299_v48 = vsub.f32 %v1134_v21, %v298_v33  ;;  %v310_v49 = vand.u32 4294901760, %v1166_v34  ;;  %v1203_v50 = vand.u32 4294901760, %v466_v41  ;;  %v288_v51 = vand.u32 4294901760, %v287_v40  ;;  %p929_p3 = pnand %p928_p2, %p924_p13 }
  0x20   : > { %271 = vmatpush.msra.mxu1 %v270_v38  ;;  %338 = vmatpush.msra.mxu2 %v1128_v19  ;;  %v1207_v52 = vsub.f32 %v469_v35, %v1191_v45  ;;  %v1210_v53 = vsub.f32 %v468_v36, %v1193_v46  ;;  %v1213_v54 = vsub.f32 %v467_v37, %v1195_v47  ;;  %v294_v57 = vand.u32 4294901760, %v293_v42 }
  0x21   : > { %374 = vmatpush.msra.mxu3 %v1104_v11  ;;  %242 = vmatpush.msra.mxu0 %v1104_v11  ;;  %v305_v55 = vsub.f32 %v1150_v29, %v304_v43  ;;  %v1221_v56 = vsub.f32 %v466_v41, %v1203_v50  ;;  %v311_v61 = vsub.f32 %v1166_v34, %v310_v49  ;;  %v300_v63 = vand.u32 4294901760, %v299_v48 }
  0x22   : > { %277 = vmatpush.msra.mxu1 %v276_v39  ;;  %341 = vmatpush.msra.mxu2 %v1131_v20  ;;  %v513_v58 = vand.u32 4294901760, %v1207_v52  ;;  %v519_v59 = vand.u32 4294901760, %v1210_v53  ;;  %v525_v60 = vand.u32 4294901760, %v1213_v54  ;;  %v1263_v15 = vand.u32 4294901760, %v465_v26 }
  0x23   : > { %376 = vmatpush.msra.mxu3 %v1106_v12  ;;  %244 = vmatpush.msra.mxu0 %v1106_v12  ;;  %v531_v62 = vand.u32 4294901760, %v1221_v56  ;;  %v306_v3 = vand.u32 4294901760, %v305_v55  ;;  %v312_v13 = vand.u32 4294901760, %v311_v61  ;;  %v1307_v20 = vand.u32 4294901760, %v462_v17 }
  0x24   : > { %283 = vmatpush.msra.mxu1 %v282_v44  ;;  %344 = vmatpush.msra.mxu2 %v1134_v21  ;;  %v514_v0 = vsub.f32 %v1207_v52, %v513_v58  ;;  %v520_v1 = vsub.f32 %v1210_v53, %v519_v59  ;;  %v526_v2 = vsub.f32 %v1213_v54, %v525_v60  ;;  %v1002_v37 = vmov 0.0  }
  0x25   : > { %378 = vmatpush.msra.mxu3 %v1125_v18  ;;  %246 = vmatpush.msra.mxu0 %v1125_v18  ;;  %v532_v9 = vsub.f32 %v1221_v56, %v531_v62  ;;  %vm707_vm2 = vcmask 261120  }
  0x26   : > { %289 = vmatpush.msra.mxu1 %v288_v51  ;;  %347 = vmatpush.msra.mxu2 %v1150_v29  ;;  %v515_v7 = vand.u32 4294901760, %v514_v0  ;;  %v521_v8 = vand.u32 4294901760, %v520_v1  ;;  %v527_v14 = vand.u32 4294901760, %v526_v2 }
  0x27   : > { %380 = vmatpush.msra.mxu3 %v1136_v22  ;;  %248 = vmatpush.msra.mxu0 %v1136_v22  ;;  %v533_v30 = vand.u32 4294901760, %v532_v9 }
  0x28   : > { %295 = vmatpush.msra.mxu1 %v294_v57  ;;  %350 = vmatpush.msra.mxu2 %v1166_v34  ;;  %v205_v34 = vlaneseq }
  0x29   : > { %399 = vmatpush.msrb.mxu0 %v268_v23  ;;  %516 = vmatpush.msrb.mxu3 %v515_v7 }
  0x2a   : > { %479 = vmatpush.msrb.mxu2 %v1191_v45  ;;  %301 = vmatpush.msra.mxu1 %v300_v63  ;;  %v206_v35 = vand.u32 127, %v205_v34 }
  0x2b   : > { %403 = vmatpush.msrb.mxu0 %v274_v24  ;;  %522 = vmatpush.msrb.mxu3 %v521_v8 }
  0x2c   : > { %481 = vmatpush.msrb.mxu2 %v1193_v46  ;;  %307 = vmatpush.msra.mxu1 %v306_v3 }
  0x2d   : > { %407 = vmatpush.msrb.mxu0 %v280_v25  ;;  %528 = vmatpush.msrb.mxu3 %v527_v14  ;;  %v1316_v25 = vsub.f32 %v462_v17, %v1307_v20 }
  0x2e   : > { %483 = vmatpush.msrb.mxu2 %v1195_v47  ;;  %313 = vmatpush.msra.mxu1 %v312_v13 }
  0x2f   : > { %534 = vmatpush.msrb.mxu3 %v533_v30  ;;  %411 = vmatpush.msrb.mxu0 %v286_v27  ;;  %v555_v29 = vand.u32 4294901760, %v1316_v25 }
  0x30   : > { %442 = vmatpush.msrb.mxu1 %v1086_v4  ;;  %485 = vmatpush.msrb.mxu2 %v1203_v50  ;;  %v464_v4 = vld [vmem:[%s1420_s2 + $0x10] sm:$0xff] }
  0x31   : > { %415 = vmatpush.msrb.mxu0 %v292_v28  ;;  %v556_v32 = vsub.f32 %v1316_v25, %v555_v29 }
  0x32   : > { %444 = vmatpush.msrb.mxu1 %v1088_v5  ;;  %487 = vmatpush.msrb.mxu2 %v1263_v15  ;;  %v1286_v5 = vand.u32 4294901760, %v464_v4 }
  0x33   : > { %419 = vmatpush.msrb.mxu0 %v298_v33  ;;  %v557_v33 = vand.u32 4294901760, %v556_v32 }
  0x34   : > { %446 = vmatpush.msrb.mxu1 %v1090_v6  ;;  %v1289_v6 = vsub.f32 %v465_v26, %v1263_v15  ;;  %489 = vmatpush.msrb.mxu2 %v1286_v5  ;;  %v1299_v16 = vsub.f32 %v464_v4, %v1286_v5 }
  0x35   : > { %423 = vmatpush.msrb.mxu0 %v304_v43 }
  0x36   : > { %448 = vmatpush.msrb.mxu1 %v1102_v10  ;;  %v463_v10 = vld [vmem:[%s1420_s2 + $0x8] sm:$0xff]  ;;  %v543_v19 = vand.u32 4294901760, %v1299_v16 }
  0x37   : > { %427 = vmatpush.msrb.mxu0 %v310_v49 }
  0x38   : > { %450 = vmatpush.msrb.mxu1 %v1104_v11  ;;  %v537_v11 = vand.u32 4294901760, %v1289_v6  ;;  %v544_v23 = vsub.f32 %v1299_v16, %v543_v19 }
  0x3a   : > { %452 = vmatpush.msrb.mxu1 %v1106_v12  ;;  %v1296_v12 = vand.u32 4294901760, %v463_v10  ;;  %v545_v27 = vand.u32 4294901760, %v544_v23 }
  0x3c   : > { %454 = vmatpush.msrb.mxu1 %v1125_v18  ;;  %v538_v18 = vsub.f32 %v1289_v6, %v537_v11  ;;  %491 = vmatpush.msrb.mxu2 %v1296_v12  ;;  %v1310_v21 = vsub.f32 %v463_v10, %v1296_v12 }
  0x3e   : > { %456 = vmatpush.msrb.mxu1 %v1136_v22  ;;  %v539_v22 = vand.u32 4294901760, %v538_v18  ;;  %493 = vmatpush.msrb.mxu2 %v1307_v20  ;;  %v549_v24 = vand.u32 4294901760, %v1310_v21 }
  0x40   : > { %540 = vmatpush.msrb.mxu3 %v539_v22  ;;  %v550_v28 = vsub.f32 %v1310_v21, %v549_v24 }
  0x42   : > { %546 = vmatpush.msrb.mxu3 %v545_v27  ;;  %v551_v31 = vand.u32 4294901760, %v550_v28 }
  0x44   : > { %552 = vmatpush.msrb.mxu3 %v551_v31 }
  0x46   : > { %558 = vmatpush.msrb.mxu3 %v557_v33 }
  0x8d   : > { %v209_v36 = vpop.permute.xlu0 %208 }
  0x8e   : > { %vm210_vm1 = vcmp.eq.s32.totalorder %v209_v36, %v206_v35 }
  0x8f   : > { %v845_v38 = vsel %vm210_vm1, 1.0, %v1002_v37 }
  0x90   : > { %846 = vmatmul.msk.f32.vlgmr.msra.gmra.mxu1 %vm221_vm0, %v845_v38  ;;  %v223_v39 = vsel %vm221_vm0, %v845_v38, 0 }
  0x91   : > { %611 = vmatpush.msra.mxu1 %v1191_v45  ;;  %v250_v40 = vsub.f32 %v223_v39, %v223_v39 }
  0x93   : > { %353 = vmatmul.f32.vlgmr.msra.gmra.mxu2 %v250_v40  ;;  %613 = vmatpush.msra.mxu1 %v1193_v46  ;;  %v251_v41 = vand.u32 4294901760, %v250_v40 }
  0x94   : > { %644 = vmatpush.msra.mxu2 %v513_v58 }
  0x95   : > { %384 = vmatmul.f32.vlgmr.msra.gmra.mxu3 %v251_v41  ;;  %615 = vmatpush.msra.mxu1 %v1195_v47  ;;  %v252_v42 = vsub.f32 %v250_v40, %v251_v41 }
  0x96   : > { %648 = vmatpush.msra.mxu2 %v519_v59  ;;  %687 = vmatpush.msra.mxu3 %v1191_v45 }
  0x97   : > { %617 = vmatpush.msra.mxu1 %v1203_v50  ;;  %v253_v43 = vand.u32 4294901760, %v252_v42 }
  0x98   : > { %848 = vmatmul.msk.f32.vlgmr.msrb.gmra.mxu1 %vm221_vm0, %v845_v38  ;;  %652 = vmatpush.msra.mxu2 %v525_v60 }
  0x99   : > { %689 = vmatpush.msra.mxu3 %v1193_v46  ;;  %254 = vmatmul.f32.vlgmr.msra.gmra.mxu0 %v253_v43 }
  0x9a   : > { %619 = vmatpush.msra.mxu1 %v1263_v15  ;;  %574 = vmatpush.msra.mxu0 %v1207_v52 }
  0x9b   : > { %656 = vmatpush.msra.mxu2 %v531_v62  ;;  %691 = vmatpush.msra.mxu3 %v1195_v47 }
  0x9c   : > { %499 = vmatmul.f32.vlgmr.msrb.gmra.mxu2 %v253_v43  ;;  %621 = vmatpush.msra.mxu1 %v1286_v5 }
  0x9d   : > { %577 = vmatpush.msra.mxu0 %v1210_v53  ;;  %660 = vmatpush.msra.mxu2 %v537_v11 }
  0x9e   : > { %693 = vmatpush.msra.mxu3 %v1203_v50  ;;  %623 = vmatpush.msra.mxu1 %v1296_v12 }
  0x9f   : > { %849 = vmatmul.msk.f32.vlgmr.msrb.gmra.mxu3 %vm221_vm0, %v845_v38  ;;  %580 = vmatpush.msra.mxu0 %v1213_v54 }
  0xa0   : > { %664 = vmatpush.msra.mxu2 %v543_v19  ;;  %695 = vmatpush.msra.mxu3 %v1263_v15 }
  0xa1   : > { %625 = vmatpush.msra.mxu1 %v1307_v20  ;;  %583 = vmatpush.msra.mxu0 %v1221_v56 }
  0xa2   : > { %629 = vmatmul.f32.vlgmr.msra.gmra.mxu1 %v251_v41  ;;  %668 = vmatpush.msra.mxu2 %v549_v24 }
  0xa3   : > { %697 = vmatpush.msra.mxu3 %v1286_v5  ;;  %847 = vmatmul.msk.f32.vlgmr.msrb.gmra.mxu0 %vm221_vm0, %v845_v38 }
  0xa4   : > { %586 = vmatpush.msra.mxu0 %v1289_v6  ;;  %672 = vmatpush.msra.mxu2 %v555_v29 }
  0xa5   : > { %699 = vmatpush.msra.mxu3 %v1296_v12  ;;  %850 = vmatmul.msk.f32.vlgmr.msra.gmra.mxu2 %vm221_vm0, %v845_v38 }
  0xa6   : > { %589 = vmatpush.msra.mxu0 %v1299_v16 }
  0xa7   : > { %701 = vmatpush.msra.mxu3 %v1307_v20 }
  0xa8   : > { %851 = vmatmul.msk.f32.vlgmr.msra.gmra.mxu3 %vm221_vm0, %v845_v38  ;;  %592 = vmatpush.msra.mxu0 %v1310_v21 }
  0xaa   : > { %595 = vmatpush.msra.mxu0 %v1316_v25 }
  0xab   : > { %598 = vmatmul.f32.vlgmr.msra.gmra.mxu0 %v250_v40 }
 0x10d   : > { %v316_v44 = vpop.f32.mrf.mxu1 }
 0x115   : > { %v459_v51 = vpop.f32.mrf.mxu1 }
 0x116   : > { %v255_v45 = vpop.f32.mrf.mxu0  ;;  %v354_v47 = vpop.f32.mrf.mxu2 }
 0x117   : > { %v317_v46 = vadd.f32 %v316_v44, %v255_v45 }
 0x118   : > { %v385_v48 = vpop.f32.mrf.mxu3 }
 0x119   : > { %v355_v49 = vadd.f32 %v354_v47, %v317_v46 }
 0x11b   : > { %v386_v50 = vadd.f32 %v385_v48, %v355_v49 }
 0x11f   : > { %v500_v54 = vpop.f32.mrf.mxu2 }
 0x120   : > { %v430_v52 = vpop.f32.mrf.mxu0 }
 0x121   : > { %v431_v53 = vadd.f32 %v430_v52, %v386_v50 }
 0x122   : > { %v561_v56 = vpop.f32.mrf.mxu3 }
 0x123   : > { %v460_v55 = vadd.f32 %v459_v51, %v431_v53 }
 0x125   : > { %708 = vst.msk [vmem:[%s192_s10] sm:$0xff] %vm707_vm2, %v460_v55 }
 0x126   : > { %932 = shalt.err (!%p929_p3)
}
 0x127   : > { %858 = dma.vmem_to_hbm [thread:$0]  (%p1066_p5), %s730_s11, 128, %s732_s12, %s712_s13   ;;  %v562_v57 = vadd.f32 %v561_v56, %v500_v54  ;;  %v630_v60 = vpop.f32.mrf.mxu1  ;;  %vm709_vm3 = vcmask 130048  }
 0x128   : > { %v599_v58 = vpop.f32.mrf.mxu0  ;;  %s741_s9 = scalar_lea.hbm %s1422_s4, %s854_s5  ;;  %v675_v62 = vpop.f32.mrf.mxu2  ;;  %s199_s10 = scalar_lea.vmem [#allocation4], %s842_s6 }
 0x129   : > { %v600_v59 = vadd.f32 %v599_v58, %v562_v57  ;;  %s743_s14 = sshll.u32 %s199_s10, 4  ;;  %s745_s20 = sshll.u32 %s741_s9, 4  ;;  %s744_s14 = int_to_ptr.vmem [resolvable:$true] %s743_s14  ;;  %s746_s20 = int_to_ptr.hbm [resolvable:$true] %s745_s20 }
 0x12a   : > { %s717_s19 = scalar_lea.sflag [#allocation5], %s1361_s30  ;;  %s947_s11 = sshra.s32 %s746_s20, 4  ;;  %s948_s11 = int_to_ptr.hbm [resolvable:$true] %s947_s11 }
 0x12b   : > { %v631_v61 = vadd.f32 %v630_v60, %v600_v59  ;;  %v704_v0 = vpop.f32.mrf.mxu3  ;;  %s949_s12 = scalar_lea.hbm %s948_s11, 8  ;;  %s953_s6 = scalar_lea.hbm %s1422_s4, 16 }
 0x12c   : > { %p950_p4 = scmp.ne.s32.totalorder %s948_s11, %s949_s12  ;;  %p954_p9 = scmp.lt.s32.totalorder %s948_s11, %s1422_s4 }
 0x12d   : > { %v676_v63 = vadd.f32 %v675_v62, %v631_v61  ;;  %p955_p10 = scmp.lt.s32.totalorder %s953_s6, %s949_s12 }
 0x12e   : > { %p951_p7 = pnand %p950_p4, %p1066_p5 }
 0x12f   : > { %v705_v1 = vadd.f32 %v704_v0, %v676_v63  ;;  %p956_p11 = por %p955_p10, %p954_p9 }
 0x130   : > { %p952_p8 = pneg %p951_p7 }
 0x131   : > { %710 = vst.msk [vmem:[%s199_s10] sm:$0xff] %vm709_vm3, %v705_v1 }
 0x132   : > { %p957_p12 = pnand %p956_p11, %p952_p8 }
 0x134   : > { %960 = shalt.err (!%p957_p12)
}
 0x135   : > { %859 = dma.vmem_to_hbm [thread:$0]  (%p1066_p5), %s744_s14, 128, %s746_s20, %s717_s19  }
 0x136 PF: > { %p869_p13 = scmp.ge.s32.totalorder %s999_s18, 2  ;;  %s757_s30 = sand.u32 1, %s987_s15  }
 0x137   : > { %s758_s27 = scalar_lea.sflag [#allocation3], %s757_s30 }
 0x138   : > { %p863_p0 = pnand %p869_p13, %p1070_p6 }
 0x13a   : > { %p864_p1 = pneg %p863_p0 }
 0x13c   : > { %978 = dma.done.wait (%p864_p1), %s758_s27, 128  }
 0x13d   : > { %980 = vsyncadd (%p864_p1), %s758_s27, 4294967168  ;;  %s768_s28 = scalar_lea.sflag [#allocation5], %s757_s30 }
 0x13e   : > { %982 = dma.done.wait (%p864_p1), %s768_s28, 128  }
 0x13f   : > { %984 = vsyncadd (%p864_p1), %s768_s28, 4294967168  ;;  %p18_p5 = scmp.ge.s32.totalorder %s1053_s21, 4   ;;  %s1425_s15 = smov %s991_s16 }
 0x140   : > { %s1426_s16 = smov %s995_s17  ;;  %s1427_s17 = smov %s1064_s24 }
 0x141   : > { %s1428_s18 = smov %s1053_s21  ;;  %20 = sbr.rel (!%p18_p5) target bundleno = 5 (0x5), region = 84 }
 0x146   :  { %774 = vsyncpa [#allocation3], 1 }
 0x147   :  { %776 = vsyncpa [#allocation3 + $0x1], 1 }
 0x148   :  { %777 = vsyncpa [#allocation5], 1 }
 0x149   :  { %779 = vsyncpa [#allocation5 + $0x1], 1 }

</bundles_post_ra>
